<compile_context>
chip_gen: v7x
topology: tpu7x:2x2x1
jax: 0.10.0
libtpu: 0.0.40
codegen_flags: <defaults>
</compile_context>

<pallas_src>
import functools

import jax
import jax.numpy as jnp
from jax.experimental import pallas as pl
from jax.experimental.pallas import tpu as pltpu


def _vmem_limit_bytes():
    """Per-generation VMEM budget for these kernels (v5e/v6e: 128 MiB phys,
    v7x: 64 MiB phys).  Use ~half the physical capacity as headroom."""
    cap = None
    try:
        cap = getattr(pltpu.get_tpu_info(), "vmem_capacity_bytes", None)
    except Exception:
        cap = None
    if not cap:
        cap = 64 * 1024 * 1024
    return int(min(max(cap // 2, 32 * 1024 * 1024), 96 * 1024 * 1024))


def _pick_block(total, quantum, unit_bytes, target_bytes):
    """Largest block size that divides `total`, is a multiple of `quantum`,
    and keeps block * unit_bytes <= target_bytes.  Falls back to the smallest
    aligned candidate, or to `total` when no aligned candidate exists."""
    if total % quantum != 0:
        return total
    cands = [t for t in range(quantum, total + 1, quantum) if total % t == 0]
    if not cands:
        return total
    fitting = [t for t in cands if t * unit_bytes <= target_bytes]
    return max(fitting) if fitting else min(cands)


# ---------------------------------------------------------------------------
# Path 1: fully fused single-launch kernel (x resident in VMEM).
# ---------------------------------------------------------------------------
def _fused_small_kernel(x_ref, o_ref, *, n_chan, chunk, hw, inv_g, inv_l):
    # x_ref: (G, M, C*H*W)    o_ref: (G, M, (C+F)*H*W)
    G, M, _ = x_ref.shape
    F, L = n_chan, chunk
    xv = x_ref[...]
    o_ref[:, :, :F * L] = xv                                   # x -> out copy
    for f in range(F):                                         # F is tiny (1-2)
        xf = xv[:, :, f * L:(f + 1) * L].astype(jnp.float32)   # (G, M, L)
        mu = jnp.sum(xf, axis=0, keepdims=True) * inv_g        # (1, M, L)
        var = jnp.sum(jnp.square(xf - mu), axis=0) * inv_g     # (M, L)
        std = jnp.sqrt(var + 1e-8)
        val = (jnp.sum(std, axis=-1, keepdims=True) * inv_l).astype(o_ref.dtype)
        o_ref[:, :, F * L + f * hw:F * L + (f + 1) * hw] = jnp.broadcast_to(
            val[None, :, :], (G, M, hw))


# ---------------------------------------------------------------------------
# Path 2 (F == 1): streaming stats fused with the x -> out copy.
# ---------------------------------------------------------------------------
def _fused_stream_kernel(x_ref, o_ref, acc_ref, *, n_main, inv_g, inv_l):
    # x_ref / o_ref blocks: (G, M, TILE_L)   acc_ref: (M, 1) f32 VMEM scratch
    k = pl.program_id(0)

    @pl.when(k == 0)
    def _init():
        acc_ref[...] = jnp.zeros_like(acc_ref)

    @pl.when(k < n_main)
    def _stream():
        xv = x_ref[...]
        o_ref[...] = xv                                        # fused copy
        xf = xv.astype(jnp.float32)
        mu = jnp.sum(xf, axis=0, keepdims=True) * inv_g        # (1, M, TILE_L)
        var = jnp.sum(jnp.square(xf - mu), axis=0) * inv_g     # (M, TILE_L)
        std = jnp.sqrt(var + 1e-8)
        acc_ref[...] += jnp.sum(std, axis=-1, keepdims=True)   # (M, 1)

    @pl.when(k == n_main)
    def _std_cols():
        # Final (partial, masked) output block starts exactly at column C*H*W;
        # only its first H*W lanes land in-bounds (the std channel).
        val = (acc_ref[...] * inv_l).astype(o_ref.dtype)       # (M, 1)
        o_ref[...] = jnp.broadcast_to(val[None, :, :], o_ref.shape)


# ---------------------------------------------------------------------------
# Path 3 fallback, kernel A: group-std reduction streamed over c*H*W.
# ---------------------------------------------------------------------------
def _stats_kernel(xg_ref, y_ref, *, inv_g, inv_l):
    k = pl.program_id(0)

    @pl.when(k == 0)
    def _init():
        y_ref[...] = jnp.zeros_like(y_ref)

    xg = xg_ref[...].astype(jnp.float32)                       # (G, MF, TILE_L)
    mu = jnp.sum(xg, axis=0, keepdims=True) * inv_g
    var = jnp.sum(jnp.square(xg - mu), axis=0) * inv_g
    std = jnp.sqrt(var + 1e-8)
    y_ref[...] += jnp.sum(std, axis=-1, keepdims=True)         # resident acc

    @pl.when(k == pl.num_programs(0) - 1)
    def _finalize():
        y_ref[...] = y_ref[...] * inv_l


# ---------------------------------------------------------------------------
# Path 3 fallback, kernel B: lane-dense copy of x + broadcast std channels.
# ---------------------------------------------------------------------------
def _assemble_kernel(y_ref, x_ref, o_ref, *, c_hw, hw, n_chan):
    # y_ref: (tn, F)    x_ref: (tn, C*H*W)    o_ref: (tn, (C+F)*H*W)
    o_ref[:, :c_hw] = x_ref[...]
    tn = x_ref.shape[0]
    yv = y_ref[...].astype(o_ref.dtype)
    for f in range(n_chan):                                    # F is tiny (1-2)
        o_ref[:, c_hw + f * hw:c_hw + (f + 1) * hw] = jnp.broadcast_to(
            yv[:, f:f + 1], (tn, hw))


def minibatch_std(x, group_size, n_chan=1, *,
                  fast_path_max_bytes=None,
                  stream_block_bytes=None,
                  stats_block_bytes=None,
                  copy_block_bytes=None):
    """Pallas implementation of MinibatchStdLayer.forward (NCHW)."""
    N, C, H, W = x.shape
    G = int(N if group_size is None else min(group_size, N))
    F = int(n_chan)
    assert N % G == 0, "batch must be divisible by group size"
    assert C % F == 0, "channels must be divisible by n_chan"
    M = N // G
    c = C // F
    HW = H * W
    L = c * HW
    MF = M * F
    itemsize = x.dtype.itemsize
    c_hw = C * HW
    o_hw = (C + F) * HW
    inv_g = 1.0 / G
    inv_l = 1.0 / L

    vmem_limit = _vmem_limit_bytes()
    if fast_path_max_bytes is None:
        fast_path_max_bytes = int(vmem_limit * 0.8)
    if stream_block_bytes is None:
        stream_block_bytes = int(vmem_limit * 0.7)
    if stats_block_bytes is None:
        stats_block_bytes = vmem_limit // 4
    if copy_block_bytes is None:
        copy_block_bytes = vmem_limit // 3

    def _params(sem):
        return pltpu.CompilerParams(dimension_semantics=sem,
                                    vmem_limit_bytes=vmem_limit)

    # ---- Path 1: fully fused single kernel ---------------------------------
    x_bytes = N * c_hw * itemsize
    out_bytes = N * o_hw * itemsize
    est_fast = 2 * (x_bytes + out_bytes) + 2 * N * c_hw * 4    # dbl-buf + f32 temps
    if est_fast <= fast_path_max_bytes:
        kern = functools.partial(_fused_small_kernel, n_chan=F, chunk=L,
                                 hw=HW, inv_g=inv_g, inv_l=inv_l)
        out3 = pl.pallas_call(
            kern,
            out_shape=jax.ShapeDtypeStruct((G, M, o_hw), x.dtype),
            grid_spec=pltpu.PrefetchScalarGridSpec(
                num_scalar_prefetch=0,
                grid=(1,),
                in_specs=[pl.BlockSpec((G, M, c_hw), lambda i: (0, 0, 0))],
                out_specs=pl.BlockSpec((G, M, o_hw), lambda i: (0, 0, 0)),
            ),
            compiler_params=_params(("arbitrary",)),
        )(x.reshape(G, M, c_hw))
        return out3.reshape(N, C + F, H, W)

    # ---- Path 2: fused streaming (F == 1) -----------------------------------
    if F == 1 and L % 128 == 0:
        # per-lane cost: double-buffered in + out blocks plus f32 temps.
        unit = N * (4 * itemsize + 8)
        tile_l = _pick_block(L, 128, unit, stream_block_bytes)
        n_l = L // tile_l
        if HW <= tile_l and tile_l * unit <= stream_block_bytes:
            kern = functools.partial(_fused_stream_kernel, n_main=n_l,
                                     inv_g=inv_g, inv_l=inv_l)
            out3 = pl.pallas_call(
                kern,
                out_shape=jax.ShapeDtypeStruct((G, M, o_hw), x.dtype),
                grid_spec=pltpu.PrefetchScalarGridSpec(
                    num_scalar_prefetch=0,
                    grid=(n_l + 1,),
                    in_specs=[pl.BlockSpec(
                        (G, M, tile_l),
                        lambda k: (0, 0, jnp.minimum(k, n_l - 1)))],
                    out_specs=pl.BlockSpec((G, M, tile_l),
                                           lambda k: (0, 0, k)),
                    scratch_shapes=[pltpu.VMEM((M, 1), jnp.float32)],
                ),
                compiler_params=_params(("arbitrary",)),
            )(x.reshape(G, M, L))
            return out3.reshape(N, C + F, H, W)

    # ---- Path 3: conservative two-kernel fallback ---------------------------
    # TODO(synk): a fully fused streaming variant for F > 1 (or lane-unaligned
    # L) would remove this path's extra HBM read of x; not implemented.
    xg = x.reshape(G, MF, L)
    stats_unit = G * MF * (2 * itemsize + 8)                   # dbl-buf + f32 temps
    tile_l = _pick_block(L, 128, stats_unit, stats_block_bytes)
    n_l = L // tile_l

    stats = functools.partial(_stats_kernel, inv_g=inv_g, inv_l=inv_l)
    y = pl.pallas_call(
        stats,
        out_shape=jax.ShapeDtypeStruct((MF, 1), jnp.float32),
        grid_spec=pltpu.PrefetchScalarGridSpec(
            num_scalar_prefetch=0,
            grid=(n_l,),
            in_specs=[pl.BlockSpec((G, MF, tile_l), lambda k: (0, 0, k))],
            out_specs=pl.BlockSpec((MF, 1), lambda k: (0, 0)),
        ),
        compiler_params=_params(("arbitrary",)),
    )(xg)

    # Per-sample std values: out[n] uses the stats of group m = n % M (tiny).
    y_full = jnp.tile(y.reshape(M, F), (G, 1)).astype(x.dtype)     # (N, F)

    x2 = x.reshape(N, c_hw)
    quantum = max(8, 32 // itemsize)                           # dtype-aware sublanes
    copy_unit = (c_hw + o_hw) * itemsize * 2                   # dbl-buffered rows
    tn = _pick_block(N, quantum, copy_unit, copy_block_bytes)
    # v7x megacore: keep >=2 parallel grid steps when the batch allows it.
    if tn == N and N >= 2 * quantum:
        half = (N // 2 // quantum) * quantum
        if half >= quantum and N % half == 0:
            tn = half

    assemble = functools.partial(_assemble_kernel, c_hw=c_hw, hw=HW, n_chan=F)
    out_flat = pl.pallas_call(
        assemble,
        out_shape=jax.ShapeDtypeStruct((N, o_hw), x.dtype),
        grid_spec=pltpu.PrefetchScalarGridSpec(
            num_scalar_prefetch=0,
            grid=(N // tn,),
            in_specs=[
                pl.BlockSpec((tn, F), lambda i: (i, 0)),       # y_full
                pl.BlockSpec((tn, c_hw), lambda i: (i, 0)),    # x rows
            ],
            out_specs=pl.BlockSpec((tn, o_hw), lambda i: (i, 0)),
        ),
        compiler_params=_params(("parallel",)),
    )(y_full, x2)

    return out_flat.reshape(N, C + F, H, W)


def ref_minibatch_std(x, group_size, n_chan=1):
    """Pure-JAX reference matching the PyTorch forward exactly."""
    N, C, H, W = x.shape
    G = N if group_size is None else min(group_size, N)
    F = n_chan
    c = C // F
    y = x.reshape(G, -1, F, c, H, W)
    y = y - y.mean(axis=0)
    y = jnp.mean(jnp.square(y), axis=0)
    y = jnp.sqrt(y + 1e-8)
    y = y.mean(axis=(2, 3, 4))
    y = y.reshape(-1, F, 1, 1)
    y = jnp.tile(y, (G, 1, H, W))
    return jnp.concatenate([x, y], axis=1)


if __name__ == "__main__":
    key = jax.random.PRNGKey(0)

    configs = [
        # (shape, group_size, n_chan, kwargs) -- kwargs force specific paths.
        # 1. Fast path (single fused kernel), F=2.
        ((8, 4, 16, 16), 4, 2, {}),
        # 2. Streaming fused path: fast path disabled, small stream budget
        #    forces 4 main tiles + 1 std tile (exercises accumulate/finalize).
        ((8, 8, 32, 32), 4, 1, {"fast_path_max_bytes": 0,
                                "stream_block_bytes": 512 * 1024}),
        # 3. Fast path with group_size=None (G=N, M=1), non-128 trailing dims.
        ((4, 4, 8, 8), None, 1, {}),
        # 4. Two-kernel fallback (F=2 streaming unsupported), multi-step stats.
        ((8, 4, 16, 16), 4, 2, {"fast_path_max_bytes": 0,
                                "stats_block_bytes": 8 * 1024}),
        # 5. Two-kernel fallback with lane-unaligned L (L=300), F=1.
        ((8, 3, 10, 10), 4, 1, {"fast_path_max_bytes": 0}),
    ]

    for idx, (shape, gs, nc, kw) in enumerate(configs):
        key, sub = jax.random.split(key)
        x = jax.random.normal(sub, shape, dtype=jnp.float32)

        out = jax.block_until_ready(minibatch_std(x, gs, nc, **kw))
        ref = ref_minibatch_std(x, gs, nc)

        N, C, H, W = shape
        assert out.shape == (N, C + nc, H, W), (idx, out.shape)
        assert out.dtype == x.dtype, (idx, out.dtype)
        err = float(jnp.max(jnp.abs(out - ref)))
        assert jnp.allclose(out, ref, atol=1e-5, rtol=1e-5), (idx, err)

    print("KERNEL_OK")
</pallas_src>

<mosaic_0001>
module attributes {stable_mosaic.version = 11 : i64} {
  func.func @_fused_small_kernel(%arg0: i32, %arg1: memref<4x2x1024xf32, #tpu.memory_space<vmem>>, %arg2: memref<4x2x1536xf32, #tpu.memory_space<vmem>>) attributes {dimension_semantics = [#tpu.dimension_semantics<arbitrary>], iteration_bounds = array<i64: 1>, scalar_prefetch = 0 : i64, scratch_operands = 0 : i64, tpu.core_type = #tpu.core_type<tc>, window_params = [{pipeline_mode = #tpu.pipeline_mode<synchronous>, transform_indices = @transform_0, window_bounds = array<i64: 4, 2, 1024>}, {pipeline_mode = #tpu.pipeline_mode<synchronous>, transform_indices = @transform_1, window_bounds = array<i64: 4, 2, 1536>}]} {
    %c0 = arith.constant 0 : index
    %c0_0 = arith.constant 0 : index
    %c0_1 = arith.constant 0 : index
    %0 = vector.load %arg1[%c0, %c0_0, %c0_1] : memref<4x2x1024xf32, #tpu.memory_space<vmem>>, vector<4x2x1024xf32>
    %c0_2 = arith.constant 0 : index
    %c0_3 = arith.constant 0 : index
    %c0_4 = arith.constant 0 : index
    %1 = vector.load %arg2[%c0_2, %c0_3, %c0_4] : memref<4x2x1536xf32, #tpu.memory_space<vmem>>, vector<4x2x1024xf32>
    tpu.vector_store %arg2[%c0_2, %c0_3, %c0_4], %0 {strides = array<i32>} : memref<4x2x1536xf32, #tpu.memory_space<vmem>>, vector<4x2x1024xf32>,
    %2 = vector.extract_strided_slice %0 {offsets = [0, 0, 0], sizes = [4, 2, 512], strides = [1, 1, 1]} : vector<4x2x1024xf32> to vector<4x2x512xf32>
    %cst = arith.constant dense<0.000000e+00> : vector<2x512xf32>
    %3 = vector.multi_reduction <add>, %2, %cst [0] : vector<4x2x512xf32> to vector<2x512xf32>
    %4 = vector.shape_cast %3 : vector<2x512xf32> to vector<1x2x512xf32>
    %cst_5 = arith.constant 2.500000e-01 : f32
    %5 = vector.broadcast %cst_5 : f32 to vector<1x2x512xf32>
    %6 = arith.mulf %4, %5 : vector<1x2x512xf32>
    %7 = vector.broadcast %6 : vector<1x2x512xf32> to vector<4x2x512xf32>
    %8 = arith.subf %2, %7 : vector<4x2x512xf32>
    %9 = arith.mulf %8, %8 : vector<4x2x512xf32>
    %cst_6 = arith.constant dense<0.000000e+00> : vector<2x512xf32>
    %10 = vector.multi_reduction <add>, %9, %cst_6 [0] : vector<4x2x512xf32> to vector<2x512xf32>
    %cst_7 = arith.constant 2.500000e-01 : f32
    %11 = vector.broadcast %cst_7 : f32 to vector<2x512xf32>
    %12 = arith.mulf %10, %11 : vector<2x512xf32>
    %cst_8 = arith.constant 9.99999993E-9 : f32
    %13 = vector.broadcast %cst_8 : f32 to vector<2x512xf32>
    %14 = arith.addf %12, %13 : vector<2x512xf32>
    %15 = math.sqrt %14 : vector<2x512xf32>
    %cst_9 = arith.constant dense<0.000000e+00> : vector<2xf32>
    %16 = vector.multi_reduction <add>, %15, %cst_9 [1] : vector<2x512xf32> to vector<2xf32>
    %17 = vector.shape_cast %16 : vector<2xf32> to vector<2x1xf32>
    %cst_10 = arith.constant 0.001953125 : f32
    %18 = vector.broadcast %cst_10 : f32 to vector<2x1xf32>
    %19 = arith.mulf %17, %18 : vector<2x1xf32>
    %20 = vector.shape_cast %19 : vector<2x1xf32> to vector<1x2x1xf32>
    %21 = vector.shape_cast %20 : vector<1x2x1xf32> to vector<1x2x1xf32>
    %22 = vector.broadcast %21 : vector<1x2x1xf32> to vector<4x2x256xf32>
    %c0_11 = arith.constant 0 : index
    %c0_12 = arith.constant 0 : index
    %c1024 = arith.constant 1024 : index
    %23 = vector.load %arg2[%c0_11, %c0_12, %c1024] : memref<4x2x1536xf32, #tpu.memory_space<vmem>>, vector<4x2x256xf32>
    tpu.vector_store %arg2[%c0_11, %c0_12, %c1024], %22 {strides = array<i32>} : memref<4x2x1536xf32, #tpu.memory_space<vmem>>, vector<4x2x256xf32>,
    %24 = vector.extract_strided_slice %0 {offsets = [0, 0, 512], sizes = [4, 2, 512], strides = [1, 1, 1]} : vector<4x2x1024xf32> to vector<4x2x512xf32>
    %cst_13 = arith.constant dense<0.000000e+00> : vector<2x512xf32>
    %25 = vector.multi_reduction <add>, %24, %cst_13 [0] : vector<4x2x512xf32> to vector<2x512xf32>
    %26 = vector.shape_cast %25 : vector<2x512xf32> to vector<1x2x512xf32>
    %cst_14 = arith.constant 2.500000e-01 : f32
    %27 = vector.broadcast %cst_14 : f32 to vector<1x2x512xf32>
    %28 = arith.mulf %26, %27 : vector<1x2x512xf32>
    %29 = vector.broadcast %28 : vector<1x2x512xf32> to vector<4x2x512xf32>
    %30 = arith.subf %24, %29 : vector<4x2x512xf32>
    %31 = arith.mulf %30, %30 : vector<4x2x512xf32>
    %cst_15 = arith.constant dense<0.000000e+00> : vector<2x512xf32>
    %32 = vector.multi_reduction <add>, %31, %cst_15 [0] : vector<4x2x512xf32> to vector<2x512xf32>
    %cst_16 = arith.constant 2.500000e-01 : f32
    %33 = vector.broadcast %cst_16 : f32 to vector<2x512xf32>
    %34 = arith.mulf %32, %33 : vector<2x512xf32>
    %cst_17 = arith.constant 9.99999993E-9 : f32
    %35 = vector.broadcast %cst_17 : f32 to vector<2x512xf32>
    %36 = arith.addf %34, %35 : vector<2x512xf32>
    %37 = math.sqrt %36 : vector<2x512xf32>
    %cst_18 = arith.constant dense<0.000000e+00> : vector<2xf32>
    %38 = vector.multi_reduction <add>, %37, %cst_18 [1] : vector<2x512xf32> to vector<2xf32>
    %39 = vector.shape_cast %38 : vector<2xf32> to vector<2x1xf32>
    %cst_19 = arith.constant 0.001953125 : f32
    %40 = vector.broadcast %cst_19 : f32 to vector<2x1xf32>
    %41 = arith.mulf %39, %40 : vector<2x1xf32>
    %42 = vector.shape_cast %41 : vector<2x1xf32> to vector<1x2x1xf32>
    %43 = vector.shape_cast %42 : vector<1x2x1xf32> to vector<1x2x1xf32>
    %44 = vector.broadcast %43 : vector<1x2x1xf32> to vector<4x2x256xf32>
    %c0_20 = arith.constant 0 : index
    %c0_21 = arith.constant 0 : index
    %c1280 = arith.constant 1280 : index
    %45 = vector.load %arg2[%c0_20, %c0_21, %c1280] : memref<4x2x1536xf32, #tpu.memory_space<vmem>>, vector<4x2x256xf32>
    tpu.vector_store %arg2[%c0_20, %c0_21, %c1280], %44 {strides = array<i32>} : memref<4x2x1536xf32, #tpu.memory_space<vmem>>, vector<4x2x256xf32>,
    return
  }
  func.func @transform_0(%arg0: i32) -> (i32, i32, i32) {
    %c0_i32 = arith.constant 0 : i32
    %c0_i32_0 = arith.constant 0 : i32
    %c0_i32_1 = arith.constant 0 : i32
    %c0_i32_2 = arith.constant 0 : i32
    return %c0_i32, %c0_i32_0, %c0_i32_1 : i32, i32, i32
  }
  func.func @transform_1(%arg0: i32) -> (i32, i32, i32) {
    %c0_i32 = arith.constant 0 : i32
    %c0_i32_0 = arith.constant 0 : i32
    %c0_i32_1 = arith.constant 0 : i32
    %c0_i32_2 = arith.constant 0 : i32
    return %c0_i32, %c0_i32_0, %c0_i32_1 : i32, i32, i32
  }
}

</mosaic_0001>

<bundles_post_ra>
// kernel: tpu_custom_call.1
= control target key start
LH: loop header
LB: loop body
LE: loop exit
PB: predicated region body
PF: predicated region fallthrough
CT: control target
= control target key end

     0   :  { %6 = vsyncpa [#allocation3], 0  ;;  %s1012_s0 = inlined_call_operand.hbm [shape: f32[4,2,1024], index: 0, kind: input, shape index: {}]   ;;  %s1013_s1 = inlined_call_operand.hbm [shape: f32[4,2,1536], index: 1, kind: output, shape index: {}]  }
   0x1   :  { %7 = vsyncpa [#allocation4], 0  ;;  %s787_s6 = smov [#allocation2]   ;;  %s739_s10 = scalar_lea.hbm %s1012_s0, 1024 }
   0x2   :  { %s13_s7 = sshll.u32 %s787_s6, 4  ;;  %p740_p0 = scmp.ne.s32.totalorder %s1012_s0, %s739_s10  ;;  %s14_s7 = int_to_ptr.vmem [resolvable:$true] %s13_s7 }
   0x3   :  { %p743_p1 = scmp.lt.u32.totalorder %s739_s10, %s1012_s0 }
   0x5   :  { %p745_p2 = pnand %p743_p1, %p740_p0 }
   0x7   :  { %748 = shalt.err (!%p745_p2)
}
   0x8   :  { %s749_s15 = scalar_lea.vmem %s14_s7, 1024  ;;  %p754_p4 = scmp.lt.s32.totalorder %s14_s7, %s14_s7 }
   0x9   :  { %p750_p3 = scmp.ne.s32.totalorder %s14_s7, %s749_s15  ;;  %p755_p5 = scmp.lt.s32.totalorder %s749_s15, %s749_s15 }
   0xb   :  { %p756_p6 = por %p755_p5, %p754_p4 }
   0xd   :  { %p757_p7 = pnand %p756_p6, %p750_p3 }
   0xf   :  { %760 = shalt.err (!%p757_p7)
}
  0x10   :  { %s788_s16 = smov 256   ;;  %s789_s17 = smov 16  }
  0x11   :  { %19 = dma.hbm_to_vmem [thread:$0]  %s1012_s0, 1024, %s14_s7, [#allocation3], %s788_s16, %s788_s16, %s789_s17  }
  0x12   :  { %783 = dma.done.wait [#allocation3], 1024  }
  0x13   :  { %784 = vsyncadd [#allocation3], 4294966272  ;;  %v47_v0 = vlaneseq  ;;  %v790_v1 = vmov 1983009808   ;;  %v822_v6 = vld [vmem:[#allocation2] sm:$0xff]  ;;  %v824_v7 = vld [vmem:[#allocation2 + $0x10] sm:$0xff] }
  0x14   :  { %v45_v2 = vunpack.c.l.s4 %v790_v1  ;;  %v826_v8 = vld [vmem:[#allocation2 + $0x20] sm:$0xff]  ;;  %vm127_vm0 = vcmask 1041408   ;;  %v828_v9 = vld [vmem:[#allocation2 + $0x30] sm:$0xff]  ;;  %33 = vst [vmem:[#allocation5 + $0x18] sm:$0xff] %v824_v7  ;;  %v43_v10 = vcombine.high %v822_v6, %v822_v6  ;;  %v60_v12 = vcombine.high %v824_v7, %v824_v7  ;;  %31 = vst [vmem:[#allocation5] sm:$0xff] %v822_v6  ;;  %s792_s0 = smov [#allocation5]  }
  0x15   :  { %v817_v3 = vshrl.u32 %v47_v0, 7  ;;  %35 = vst [vmem:[#allocation5 + $0x30] sm:$0xff] %v826_v8  ;;  %v841_v14 = vld [vmem:[#allocation2 + $0x8] sm:$0xff]  ;;  %v843_v15 = vld [vmem:[#allocation2 + $0x18] sm:$0xff]  ;;  %37 = vst [vmem:[#allocation5 + $0x48] sm:$0xff] %v828_v9  ;;  %v77_v16 = vcombine.high %v826_v8, %v826_v8  ;;  %v94_v18 = vcombine.high %v828_v9, %v828_v9  ;;  %s695_s20 = sshll.u32 %s792_s0, 4  ;;  %s696_s20 = int_to_ptr.vmem [resolvable:$true] %s695_s20 }
  0x16   :  { %v46_v4 = vunpack.c.0.s8 %v45_v2  ;;  %v854_v20 = vld [vmem:[#allocation2 + $0x28] sm:$0xff]  ;;  %v856_v21 = vld [vmem:[#allocation2 + $0x38] sm:$0xff]  ;;  %32 = vst [vmem:[#allocation5 + $0x8] sm:$0xff] %v841_v14  ;;  %34 = vst [vmem:[#allocation5 + $0x20] sm:$0xff] %v843_v15  ;;  %v369_v57 = vcombine.high %v841_v14, %v841_v14  ;;  %v386_v0 = vcombine.high %v843_v15, %v843_v15  ;;  %s761_s21 = scalar_lea.vmem %s696_s20, 1536  ;;  %p766_p9 = scmp.lt.s32.totalorder %s696_s20, %s696_s20 }
  0x17   :  { %36 = vst [vmem:[#allocation5 + $0x38] sm:$0xff] %v854_v20  ;;  %38 = vst [vmem:[#allocation5 + $0x50] sm:$0xff] %v856_v21  ;;  %p762_p8 = scmp.ne.s32.totalorder %s696_s20, %s761_s21  ;;  %p767_p10 = scmp.lt.s32.totalorder %s761_s21, %s761_s21 }
  0x18   :  { %v820_v5 = vsub.s32 %v46_v4, %v817_v3 }
  0x19   :  { %p768_p11 = por %p767_p10, %p766_p9 }
  0x1a   :  { %v50_v11 = vrot.slane %v822_v6, %v820_v5  ;;  %v67_v13 = vrot.slane %v824_v7, %v820_v5  ;;  %v84_v17 = vrot.slane %v826_v8, %v820_v5  ;;  %v101_v19 = vrot.slane %v828_v9, %v820_v5 }
  0x1b   :  { %v57_v22 = vrot.slane %v43_v10, %v820_v5  ;;  %v74_v24 = vrot.slane %v60_v12, %v820_v5  ;;  %v91_v26 = vrot.slane %v77_v16, %v820_v5  ;;  %v108_v28 = vrot.slane %v94_v18, %v820_v5  ;;  %p769_p12 = pnand %p768_p11, %p762_p8 }
  0x1c   :  { %v58_v23 = vcombine.high %v50_v11, %v50_v11  ;;  %v75_v25 = vcombine.high %v67_v13, %v67_v13  ;;  %v92_v27 = vcombine.high %v84_v17, %v84_v17  ;;  %v109_v29 = vcombine.high %v101_v19, %v101_v19 }
  0x1d   :  { %v59_v30 = vcombine.high %v57_v22, %v57_v22  ;;  %v76_v31 = vcombine.high %v74_v24, %v74_v24  ;;  %v128_v32 = vsel %vm127_vm0, %v50_v11, 0.0  ;;  %v129_v33 = vsel %vm127_vm0, %v67_v13, 0.0 }
  0x1e   :  { %v93_v34 = vcombine.high %v91_v26, %v91_v26  ;;  %v110_v35 = vcombine.high %v108_v28, %v108_v28  ;;  %v130_v36 = vadd.f32 %v129_v33, %v128_v32  ;;  %v131_v37 = vsel %vm127_vm0, %v84_v17, 0.0 }
  0x1f   :  { %v133_v38 = vsel %vm127_vm0, %v101_v19, 0.0  ;;  %v135_v39 = vsel %vm127_vm0, %v58_v23, 0.0  ;;  %v136_v40 = vsel %vm127_vm0, %v75_v25, 0.0  ;;  %v138_v41 = vsel %vm127_vm0, %v92_v27, 0.0 }
  0x20   :  { %v132_v42 = vadd.f32 %v131_v37, %v130_v36  ;;  %v137_v43 = vadd.f32 %v136_v40, %v135_v39  ;;  %v140_v44 = vsel %vm127_vm0, %v109_v29, 0.0  ;;  %v142_v45 = vsel %vm127_vm0, %v57_v22, 0.0 }
  0x21   :  { %v143_v46 = vsel %vm127_vm0, %v74_v24, 0.0  ;;  %v145_v47 = vsel %vm127_vm0, %v91_v26, 0.0  ;;  %v147_v48 = vsel %vm127_vm0, %v108_v28, 0.0  ;;  %v149_v49 = vsel %vm127_vm0, %v59_v30, 0.0 }
  0x22   :  { %v134_v50 = vadd.f32 %v133_v38, %v132_v42  ;;  %v139_v51 = vadd.f32 %v138_v41, %v137_v43  ;;  %v144_v52 = vadd.f32 %v143_v46, %v142_v45  ;;  %v150_v53 = vsel %vm127_vm0, %v76_v31, 0.0 }
  0x23   :  { %v151_v54 = vadd.f32 %v150_v53, %v149_v49  ;;  %v152_v55 = vsel %vm127_vm0, %v93_v34, 0.0  ;;  %v154_v56 = vsel %vm127_vm0, %v110_v35, 0.0  ;;  %v376_v61 = vrot.slane %v841_v14, %v820_v5 }
  0x24   :  { %v141_v58 = vadd.f32 %v140_v44, %v139_v51  ;;  %v146_v59 = vadd.f32 %v145_v47, %v144_v52  ;;  %v156_v60 = vmul.f32 0.25, %v134_v50  ;;  %v383_v63 = vrot.slane %v369_v57, %v820_v5 }
  0x25   :  { %v153_v62 = vadd.f32 %v152_v55, %v151_v54  ;;  %v393_v1 = vrot.slane %v843_v15, %v820_v5  ;;  %v384_v10 = vcombine.high %v376_v61, %v376_v61  ;;  %v403_v11 = vcombine.high %v854_v20, %v854_v20 }
  0x26   :  { %v148_v2 = vadd.f32 %v147_v48, %v146_v59  ;;  %v157_v4 = vmul.f32 0.25, %v141_v58  ;;  %v385_v13 = vcombine.high %v383_v63, %v383_v63  ;;  %v400_v16 = vrot.slane %v386_v0, %v820_v5 }
  0x27   :  { %v155_v12 = vadd.f32 %v154_v56, %v153_v62  ;;  %v401_v17 = vcombine.high %v393_v1, %v393_v1  ;;  %v410_v22 = vrot.slane %v854_v20, %v820_v5  ;;  %v417_v23 = vrot.slane %v403_v11, %v820_v5 }
  0x28   :  { %v158_v18 = vmul.f32 0.25, %v148_v2  ;;  %v164_v19 = vcombine.low %v156_v60, %v157_v4  ;;  %v402_v25 = vcombine.high %v400_v16, %v400_v16  ;;  %v420_v26 = vcombine.high %v856_v21, %v856_v21 }
  0x29   :  { %v159_v24 = vmul.f32 0.25, %v155_v12  ;;  %v427_v27 = vrot.slane %v856_v21, %v820_v5  ;;  %v418_v29 = vcombine.high %v410_v22, %v410_v22  ;;  %v419_v30 = vcombine.high %v417_v23, %v417_v23 }
  0x2a   :  { %v172_v28 = vrot.slane %v164_v19, %v820_v5  ;;  %v453_v31 = vsel %vm127_vm0, %v376_v61, 0.0  ;;  %v434_v33 = vrot.slane %v420_v26, %v820_v5  ;;  %v454_v35 = vsel %vm127_vm0, %v393_v1, 0.0 }
  0x2b   :  { %v165_v32 = vcombine.low %v158_v18, %v159_v24  ;;  %v435_v34 = vcombine.high %v427_v27, %v427_v27  ;;  %v455_v36 = vadd.f32 %v454_v35, %v453_v31  ;;  %v456_v37 = vsel %vm127_vm0, %v410_v22, 0.0 }
  0x2c   :  { %v458_v38 = vsel %vm127_vm0, %v427_v27, 0.0  ;;  %v460_v39 = vsel %vm127_vm0, %v384_v10, 0.0  ;;  %v436_v41 = vcombine.high %v434_v33, %v434_v33  ;;  %v461_v42 = vsel %vm127_vm0, %v401_v17, 0.0 }
  0x2d   :  { %v179_v40 = vrot.slane %v165_v32, %v820_v5  ;;  %v463_v43 = vsel %vm127_vm0, %v418_v29, 0.0  ;;  %v457_v44 = vadd.f32 %v456_v37, %v455_v36  ;;  %v462_v45 = vadd.f32 %v461_v42, %v460_v39 }
  0x2e   :  { %v465_v46 = vsel %vm127_vm0, %v435_v34, 0.0  ;;  %v467_v47 = vsel %vm127_vm0, %v383_v63, 0.0  ;;  %v468_v49 = vsel %vm127_vm0, %v400_v16, 0.0  ;;  %v470_v50 = vsel %vm127_vm0, %v417_v23, 0.0 }
  0x2f   :  { %v180_v48 = vcombine.low %v172_v28, %v179_v40  ;;  %v472_v51 = vsel %vm127_vm0, %v434_v33, 0.0  ;;  %v459_v52 = vadd.f32 %v458_v38, %v457_v44  ;;  %v464_v53 = vadd.f32 %v463_v43, %v462_v45 }
  0x30   :  { %v469_v54 = vadd.f32 %v468_v49, %v467_v47  ;;  %v474_v55 = vsel %vm127_vm0, %v385_v13, 0.0  ;;  %v475_v62 = vsel %vm127_vm0, %v402_v25, 0.0  ;;  %v477_v63 = vsel %vm127_vm0, %v419_v30, 0.0 }
  0x31   :  { %v182_v56 = vsub.f32 %v822_v6, %v180_v48  ;;  %v183_v57 = vsub.f32 %v824_v7, %v180_v48  ;;  %v184_v58 = vsub.f32 %v826_v8, %v180_v48  ;;  %v185_v59 = vsub.f32 %v828_v9, %v180_v48 }
  0x32   :  { %v466_v60 = vadd.f32 %v465_v46, %v464_v53  ;;  %v471_v61 = vadd.f32 %v470_v50, %v469_v54  ;;  %v476_v11 = vadd.f32 %v475_v62, %v474_v55  ;;  %v479_v6 = vsel %vm127_vm0, %v436_v41, 0.0 }
  0x33   :  { %v186_v0 = vmul.f32 %v182_v56, %v182_v56  ;;  %v187_v1 = vmul.f32 %v183_v57, %v183_v57  ;;  %v188_v2 = vmul.f32 %v184_v58, %v184_v58  ;;  %v189_v4 = vmul.f32 %v185_v59, %v185_v59 }
  0x34   :  { %v473_v10 = vadd.f32 %v472_v51, %v471_v61  ;;  %v924_v12 = vmul.f32 0.25, %v459_v52  ;;  %v478_v57 = vadd.f32 %v477_v63, %v476_v11  ;;  %v482_v62 = vmul.f32 0.25, %v466_v60 }
  0x35   :  { %v194_v7 = vcombine.high %v186_v0, %v186_v0  ;;  %v201_v8 = vrot.slane %v186_v0, %v820_v5  ;;  %v211_v9 = vcombine.high %v187_v1, %v187_v1  ;;  %v218_v13 = vrot.slane %v187_v1, %v820_v5 }
  0x36   :  { %v228_v16 = vcombine.high %v188_v2, %v188_v2  ;;  %v235_v17 = vrot.slane %v188_v2, %v820_v5  ;;  %v245_v18 = vcombine.high %v189_v4, %v189_v4  ;;  %v252_v19 = vrot.slane %v189_v4, %v820_v5 }
  0x37   :  { %v208_v22 = vrot.slane %v194_v7, %v820_v5  ;;  %v209_v23 = vcombine.high %v201_v8, %v201_v8  ;;  %v225_v24 = vrot.slane %v211_v9, %v820_v5  ;;  %v226_v25 = vcombine.high %v218_v13, %v218_v13 }
  0x38   :  { %v242_v26 = vrot.slane %v228_v16, %v820_v5  ;;  %v243_v27 = vcombine.high %v235_v17, %v235_v17  ;;  %v259_v28 = vrot.slane %v245_v18, %v820_v5  ;;  %v260_v29 = vcombine.high %v252_v19, %v252_v19 }
  0x39   :  { %v210_v30 = vcombine.high %v208_v22, %v208_v22  ;;  %v227_v31 = vcombine.high %v225_v24, %v225_v24  ;;  %v278_v32 = vsel %vm127_vm0, %v201_v8, 0.0  ;;  %v279_v33 = vsel %vm127_vm0, %v218_v13, 0.0 }
  0x3a   :  { %v244_v34 = vcombine.high %v242_v26, %v242_v26  ;;  %v261_v35 = vcombine.high %v259_v28, %v259_v28  ;;  %v280_v36 = vadd.f32 %v279_v33, %v278_v32  ;;  %v281_v37 = vsel %vm127_vm0, %v235_v17, 0.0 }
  0x3b   :  { %v283_v38 = vsel %vm127_vm0, %v252_v19, 0.0  ;;  %v285_v39 = vsel %vm127_vm0, %v209_v23, 0.0  ;;  %v286_v40 = vsel %vm127_vm0, %v226_v25, 0.0  ;;  %v288_v41 = vsel %vm127_vm0, %v243_v27, 0.0 }
  0x3c   :  { %v282_v42 = vadd.f32 %v281_v37, %v280_v36  ;;  %v287_v43 = vadd.f32 %v286_v40, %v285_v39  ;;  %v290_v44 = vsel %vm127_vm0, %v260_v29, 0.0  ;;  %v292_v45 = vsel %vm127_vm0, %v208_v22, 0.0 }
  0x3d   :  { %v293_v46 = vsel %vm127_vm0, %v225_v24, 0.0  ;;  %v295_v47 = vsel %vm127_vm0, %v242_v26, 0.0  ;;  %v297_v48 = vsel %vm127_vm0, %v259_v28, 0.0  ;;  %v299_v49 = vsel %vm127_vm0, %v210_v30, 0.0 }
  0x3e   :  { %v284_v50 = vadd.f32 %v283_v38, %v282_v42  ;;  %v289_v51 = vadd.f32 %v288_v41, %v287_v43  ;;  %v294_v52 = vadd.f32 %v293_v46, %v292_v45  ;;  %v300_v53 = vsel %vm127_vm0, %v227_v31, 0.0 }
  0x3f   :  { %v301_v54 = vadd.f32 %v300_v53, %v299_v49  ;;  %v302_v55 = vsel %vm127_vm0, %v244_v34, 0.0  ;;  %v304_v56 = vsel %vm127_vm0, %v261_v35, 0.0  ;;  %v480_v1 = vadd.f32 %v479_v6, %v478_v57 }
  0x40   :  { %v291_v58 = vadd.f32 %v290_v44, %v289_v51  ;;  %v296_v59 = vadd.f32 %v295_v47, %v294_v52  ;;  %v306_v61 = vmul.f32 0.25, %v284_v50  ;;  %v483_v2 = vmul.f32 0.25, %v473_v10 }
  0x41   :  { %v303_v0 = vadd.f32 %v302_v55, %v301_v54  ;;  %v484_v13 = vmul.f32 0.25, %v480_v1  ;;  %v489_v16 = vcombine.low %v924_v12, %v482_v62 }
  0x42   :  { %v298_v4 = vadd.f32 %v297_v48, %v296_v59  ;;  %v307_v7 = vmul.f32 0.25, %v291_v58  ;;  %v310_v8 = vadd.f32 1e-08, %v306_v61 }
  0x43   :  { %v305_v9 = vadd.f32 %v304_v56, %v303_v0  ;;  %v490_v22 = vcombine.low %v483_v2, %v484_v13  ;;  %v497_v60 = vrot.slane %v489_v16, %v820_v5 }
  0x44   :  { %v308_v17 = vmul.f32 0.25, %v298_v4  ;;  %v311_v18 = vadd.f32 1e-08, %v307_v7  ;;  %723 = vrsqrt.f32 %v310_v8  ;;  %vm316_vm1 = vcmp.eq.f32.partialorder %v310_v8, inf }
  0x45   :  { %v309_v19 = vmul.f32 0.25, %v305_v9  ;;  %v504_v6 = vrot.slane %v490_v22, %v820_v5  ;;  %vm318_vm2 = vcmp.eq.f32.partialorder %v310_v8, 0.0  ;;  %v319_v23 = vand.u32 2147483648, %v310_v8 }
  0x46   :  { %v312_v63 = vadd.f32 1e-08, %v308_v17  ;;  %725 = vrsqrt.f32 %v311_v18  ;;  %vm323_vm3 = vcmp.eq.f32.partialorder %v311_v18, inf  ;;  %vm325_vm4 = vcmp.eq.f32.partialorder %v311_v18, 0.0 }
  0x47   :  { %v313_v11 = vadd.f32 1e-08, %v309_v19  ;;  %v505_v10 = vcombine.low %v497_v60, %v504_v6  ;;  %v326_v27 = vand.u32 2147483648, %v311_v18 }
  0x48   :  { %727 = vrsqrt.f32 %v312_v63  ;;  %vm330_vm5 = vcmp.eq.f32.partialorder %v312_v63, inf  ;;  %vm332_vm6 = vcmp.eq.f32.partialorder %v312_v63, 0.0  ;;  %v333_v28 = vand.u32 2147483648, %v312_v63 }
  0x49   :  { %729 = vrsqrt.f32 %v313_v11  ;;  %v507_v12 = vsub.f32 %v841_v14, %v505_v10  ;;  %v508_v24 = vsub.f32 %v843_v15, %v505_v10  ;;  %v509_v25 = vsub.f32 %v854_v20, %v505_v10 }
  0x4a   :  { %v510_v26 = vsub.f32 %v856_v21, %v505_v10  ;;  %vm337_vm7 = vcmp.eq.f32.partialorder %v313_v11, inf  ;;  %vm339_vm8 = vcmp.eq.f32.partialorder %v313_v11, 0.0  ;;  %v340_v34 = vand.u32 2147483648, %v313_v11 }
  0x4b   :  { %v511_v30 = vmul.f32 %v507_v12, %v507_v12  ;;  %v512_v31 = vmul.f32 %v508_v24, %v508_v24  ;;  %v513_v32 = vmul.f32 %v509_v25, %v509_v25 }
  0x4c   :  { %v514_v35 = vmul.f32 %v510_v26, %v510_v26 }
  0x4d   :  { %v519_v36 = vcombine.high %v511_v30, %v511_v30  ;;  %v526_v15 = vrot.slane %v511_v30, %v820_v5  ;;  %v536_v20 = vcombine.high %v512_v31, %v512_v31  ;;  %v543_v21 = vrot.slane %v512_v31, %v820_v5 }
  0x4e   :  { %v724_v29 = vpop.eup %723  ;;  %v553_v39 = vcombine.high %v513_v32, %v513_v32  ;;  %v560_v40 = vrot.slane %v513_v32, %v820_v5  ;;  %v570_v0 = vcombine.high %v514_v35, %v514_v35  ;;  %v577_v7 = vrot.slane %v514_v35, %v820_v5 }
  0x4f   :  { %v315_v33 = vmul.f32 %v724_v29, %v310_v8  ;;  %v533_v43 = vrot.slane %v519_v36, %v820_v5  ;;  %v534_v44 = vcombine.high %v526_v15, %v526_v15  ;;  %v550_v45 = vrot.slane %v536_v20, %v820_v5 }
  0x50   :  { %v726_v14 = vpop.eup %725  ;;  %v551_v50 = vcombine.high %v543_v21, %v543_v21  ;;  %v567_v57 = vrot.slane %v553_v39, %v820_v5  ;;  %v568_v58 = vcombine.high %v560_v40, %v560_v40  ;;  %v584_v13 = vrot.slane %v570_v0, %v820_v5 }
  0x51   :  { %v317_v37 = vsel %vm316_vm1, %v310_v8, %v315_v33  ;;  %v322_v38 = vmul.f32 %v726_v14, %v311_v18  ;;  %v535_v53 = vcombine.high %v533_v43, %v533_v43  ;;  %v552_v54 = vcombine.high %v550_v45, %v550_v45 }
  0x52   :  { %v728_v41 = vpop.eup %727  ;;  %v320_v42 = vsel %vm318_vm2, %v319_v23, %v317_v37  ;;  %v569_v4 = vcombine.high %v567_v57, %v567_v57  ;;  %v603_v16 = vsel %vm127_vm0, %v526_v15, 0.0  ;;  %v585_v17 = vcombine.high %v577_v7, %v577_v7 }
  0x53   :  { %v730_v46 = vpop.eup %729  ;;  %v324_v47 = vsel %vm323_vm3, %v311_v18, %v322_v38  ;;  %v329_v48 = vmul.f32 %v728_v41, %v312_v63  ;;  %v342_v49 = vsel %vm127_vm0, %v320_v42, 0.0  ;;  %v604_v18 = vsel %vm127_vm0, %v543_v21, 0.0 }
  0x54   :  { %v327_v51 = vsel %vm325_vm4, %v326_v27, %v324_v47  ;;  %v336_v52 = vmul.f32 %v730_v46, %v313_v11  ;;  %v606_v19 = vsel %vm127_vm0, %v560_v40, 0.0  ;;  %v608_v22 = vsel %vm127_vm0, %v577_v7, 0.0 }
  0x55   :  { %v331_v55 = vsel %vm330_vm5, %v312_v63, %v329_v48  ;;  %v343_v56 = vsel %vm127_vm0, %v327_v51, 0.0  ;;  %v605_v60 = vadd.f32 %v604_v18, %v603_v16  ;;  %v610_v6 = vsel %vm127_vm0, %v534_v44, 0.0 }
  0x56   :  { %v334_v59 = vsel %vm332_vm6, %v333_v28, %v331_v55  ;;  %v338_v61 = vsel %vm337_vm7, %v313_v11, %v336_v52  ;;  %v344_v62 = vadd.f32 %v343_v56, %v342_v49  ;;  %v586_v11 = vcombine.high %v584_v13, %v584_v13 }
  0x57   :  { %v341_v1 = vsel %vm339_vm8, %v340_v34, %v338_v61  ;;  %v345_v2 = vsel %vm127_vm0, %v334_v59, 0.0  ;;  %v611_v10 = vsel %vm127_vm0, %v551_v50, 0.0  ;;  %v613_v23 = vsel %vm127_vm0, %v568_v58, 0.0 }
  0x58   :  { %v346_v8 = vadd.f32 %v345_v2, %v344_v62  ;;  %v347_v9 = vsel %vm127_vm0, %v341_v1, 0.0  ;;  %v615_v5 = vsel %vm127_vm0, %v585_v17, 0.0  ;;  %v617_v12 = vsel %vm127_vm0, %v533_v43, 0.0 }
  0x59   :  { %v607_v24 = vadd.f32 %v606_v19, %v605_v60  ;;  %v612_v25 = vadd.f32 %v611_v10, %v610_v6  ;;  %v618_v26 = vsel %vm127_vm0, %v550_v45, 0.0  ;;  %v620_v27 = vsel %vm127_vm0, %v567_v57, 0.0 }
  0x5a   :  { %v348_v63 = vadd.f32 %v347_v9, %v346_v8  ;;  %v619_v28 = vadd.f32 %v618_v26, %v617_v12  ;;  %v622_v29 = vsel %vm127_vm0, %v584_v13, 0.0  ;;  %v624_v30 = vsel %vm127_vm0, %v535_v53, 0.0 }
  0x5b   :  { %v625_v31 = vsel %vm127_vm0, %v552_v54, 0.0  ;;  %v609_v32 = vadd.f32 %v608_v22, %v607_v24  ;;  %v614_v33 = vadd.f32 %v613_v23, %v612_v25  ;;  %v627_v35 = vsel %vm127_vm0, %v569_v4, 0.0 }
  0x5c   :  { %349 = vadd.xlane.f32.xlu0 %v348_v63  ;;  %v626_v34 = vadd.f32 %v625_v31, %v624_v30  ;;  %v621_v14 = vadd.f32 %v620_v27, %v619_v28  ;;  %v629_v36 = vsel %vm127_vm0, %v586_v11, 0.0  ;;  %v791_v19 = vmov 269488144  }
  0x5d   :  { %v616_v15 = vadd.f32 %v615_v5, %v614_v33  ;;  %v631_v21 = vmul.f32 0.25, %v609_v32  ;;  %v354_v22 = vunpack.c.l.s4 %v791_v19 }
  0x5e   :  { %v628_v20 = vadd.f32 %v627_v35, %v626_v34  ;;  %v623_v37 = vadd.f32 %v622_v29, %v621_v14 }
  0x5f   :  { %v632_v39 = vmul.f32 0.25, %v616_v15  ;;  %v635_v40 = vadd.f32 1e-08, %v631_v21  ;;  %v355_v63 = vunpack.c.0.s8 %v354_v22 }
  0x60   :  { %v630_v38 = vadd.f32 %v629_v36, %v628_v20  ;;  %v633_v41 = vmul.f32 0.25, %v623_v37 }
  0x61   :  { %v636_v43 = vadd.f32 1e-08, %v632_v39  ;;  %731 = vrsqrt.f32 %v635_v40  ;;  %vm641_vm9 = vcmp.eq.f32.partialorder %v635_v40, inf  ;;  %v644_v47 = vand.u32 2147483648, %v635_v40 }
  0x62   :  { %v634_v42 = vmul.f32 0.25, %v630_v38  ;;  %v637_v44 = vadd.f32 1e-08, %v633_v41  ;;  %vm643_vm10 = vcmp.eq.f32.partialorder %v635_v40, 0.0  ;;  %v358_v11 = vsub.s32 %v355_v63, %v817_v3 }
  0x63   :  { %733 = vrsqrt.f32 %v636_v43  ;;  %vm648_vm11 = vcmp.eq.f32.partialorder %v636_v43, inf  ;;  %vm650_vm12 = vcmp.eq.f32.partialorder %v636_v43, 0.0  ;;  %v651_v50 = vand.u32 2147483648, %v636_v43 }
  0x64   :  { %v638_v45 = vadd.f32 1e-08, %v634_v42  ;;  %735 = vrsqrt.f32 %v637_v44  ;;  %vm655_vm13 = vcmp.eq.f32.partialorder %v637_v44, inf  ;;  %vm657_vm14 = vcmp.eq.f32.partialorder %v637_v44, 0.0 }
  0x65   :  { %v658_v54 = vand.u32 2147483648, %v637_v44 }
  0x66   :  { %737 = vrsqrt.f32 %v638_v45  ;;  %vm662_vm15 = vcmp.eq.f32.partialorder %v638_v45, inf  ;;  %v665_v58 = vand.u32 2147483648, %v638_v45  ;;  %vm664_vm1 = vcmp.eq.f32.partialorder %v638_v45, 0.0 }
  0x6b   :  { %v732_v46 = vpop.eup %731 }
  0x6c   :  { %v640_v48 = vmul.f32 %v732_v46, %v635_v40 }
  0x6d   :  { %v734_v49 = vpop.eup %733 }
  0x6e   :  { %v736_v51 = vpop.eup %735  ;;  %v642_v52 = vsel %vm641_vm9, %v635_v40, %v640_v48  ;;  %v647_v53 = vmul.f32 %v734_v49, %v636_v43 }
  0x6f   :  { %v645_v56 = vsel %vm643_vm10, %v644_v47, %v642_v52  ;;  %v654_v57 = vmul.f32 %v736_v51, %v637_v44 }
  0x70   :  { %v738_v55 = vpop.eup %737  ;;  %v649_v59 = vsel %vm648_vm11, %v636_v43, %v647_v53  ;;  %v667_v62 = vsel %vm127_vm0, %v645_v56, 0.0 }
  0x71   :  { %v661_v61 = vmul.f32 %v738_v55, %v638_v45  ;;  %v652_v0 = vsel %vm650_vm12, %v651_v50, %v649_v59  ;;  %v656_v1 = vsel %vm655_vm13, %v637_v44, %v654_v57 }
  0x72   :  { %v659_v2 = vsel %vm657_vm14, %v658_v54, %v656_v1  ;;  %v668_v7 = vsel %vm127_vm0, %v652_v0, 0.0 }
  0x73   :  { %v663_v4 = vsel %vm662_vm15, %v638_v45, %v661_v61  ;;  %v669_v9 = vadd.f32 %v668_v7, %v667_v62  ;;  %v670_v13 = vsel %vm127_vm0, %v659_v2, 0.0 }
  0x74   :  { %v666_v8 = vsel %vm664_vm1, %v665_v58, %v663_v4 }
  0x75   :  { %v672_v16 = vsel %vm127_vm0, %v666_v8, 0.0  ;;  %v671_v17 = vadd.f32 %v670_v13, %v669_v9 }
  0x77   :  { %v673_v18 = vadd.f32 %v672_v16, %v671_v17 }
  0x79   :  { %674 = vadd.xlane.f32.xlu0 %v673_v18 }
  0xe9   :  { %v350_v60 = vpop.xlane.xlu0 %349 }
  0xea   :  { %v351_v6 = vmul.f32 0.001953125, %v350_v60 }
  0xec   :  { %v359_v10 = vrot.slane %v351_v6, %v358_v11 }
  0xee   :  { %361 = vst [vmem:[#allocation5 + $0x10] sm:$0xf] %v359_v10  ;;  %362 = vst [vmem:[#allocation5 + $0x28] sm:$0xf] %v359_v10 }
  0xef   :  { %363 = vst [vmem:[#allocation5 + $0x40] sm:$0xf] %v359_v10  ;;  %364 = vst [vmem:[#allocation5 + $0x58] sm:$0xf] %v359_v10 }
 0x106   :  { %v675_v23 = vpop.xlane.xlu0 %674 }
 0x107   :  { %v676_v5 = vmul.f32 0.001953125, %v675_v23 }
 0x109   :  { %v684_v12 = vrot.slane %v676_v5, %v358_v11 }
 0x10b   :  { %686 = vst [vmem:[#allocation5 + $0x14] sm:$0xf] %v684_v12  ;;  %687 = vst [vmem:[#allocation5 + $0x2c] sm:$0xf] %v684_v12 }
 0x10c   :  { %688 = vst [vmem:[#allocation5 + $0x44] sm:$0xf] %v684_v12  ;;  %689 = vst [vmem:[#allocation5 + $0x5c] sm:$0xf] %v684_v12 }
 0x10d   :  { %772 = shalt.err (!%p769_p12)
}
 0x10e   :  { %s773_s24 = scalar_lea.hbm %s1013_s1, 1536 }
 0x10f   :  { %p774_p13 = scmp.ne.s32.totalorder %s1013_s1, %s773_s24  ;;  %p777_p0 = scmp.lt.u32.totalorder %s773_s24, %s1013_s1 }
 0x111   :  { %p779_p1 = pnand %p777_p0, %p774_p13 }
 0x113   :  { %782 = shalt.err (!%p779_p1)
}
 0x114   :  { %s793_s29 = smov 384   ;;  %s794_s30 = smov 24  }
 0x115   :  { %701 = dma.vmem_to_hbm [thread:$0]  %s696_s20, 1536, %s1013_s1, [#allocation4], %s793_s29, %s793_s29, %s794_s30  }
 0x116   :  { %785 = dma.done.wait [#allocation4], 1536  }
 0x117   :  { %786 = vsyncadd [#allocation4], 4294965760 }
 0x118   :  { %705 = vsyncpa [#allocation3], 1 }
 0x119   :  { %706 = vsyncpa [#allocation4], 1 }

</bundles_post_ra>
